<compile_context>
chip_gen: v7x
topology: tpu7x:2x2x1
jax: 0.10.0
libtpu: 0.0.40
codegen_flags: <defaults>
</compile_context>

<pallas_src>
import functools

import jax
import jax.numpy as jnp
from jax.experimental import pallas as pl
from jax.experimental.pallas import tpu as pltpu


_VMEM = pl.BlockSpec(memory_space=pltpu.MemorySpace.VMEM)


# ---------------------------------------------------------------------------
# Kernels
# ---------------------------------------------------------------------------

def _step_kernel(x_ref, h_ref, c_ref, wih_ref, whh_ref, b_ref, wout_ref,
                 bout_ref, stop_ref, h_out_ref, c_out_ref, *, hp):
    """One LSTMCell step + stop head (single decode token).

    x and h arrive as separate refs (no wrapper-side concat / extra HBM
    round-trip); both gate matmuls accumulate into the same f32 gates.  h/c
    are aliased in/out via input_output_aliases in the wrapper.
    """
    gates = (
        jnp.dot(x_ref[...].astype(wih_ref.dtype), wih_ref[...],
                preferred_element_type=jnp.float32)
        + jnp.dot(h_ref[...].astype(whh_ref.dtype), whh_ref[...],
                  preferred_element_type=jnp.float32)
        + b_ref[...])

    i_g = jax.nn.sigmoid(gates[:, 0 * hp:1 * hp])      # lane-aligned slices
    f_g = jax.nn.sigmoid(gates[:, 1 * hp:2 * hp])
    g_g = jnp.tanh(gates[:, 2 * hp:3 * hp])
    o_g = jax.nn.sigmoid(gates[:, 3 * hp:4 * hp])

    c_new = f_g * c_ref[...] + i_g * g_g
    h_new = o_g * jnp.tanh(c_new)

    # Stop head: VPU multiply + XLU lane reduction (no N=1 MXU push).  This is
    # a single (B, 1) column per decode call; the lane-dense multi-step stop
    # layout is handled by the rollout kernel below.
    logit = jnp.sum(h_new * wout_ref[...], axis=-1, keepdims=True) + bout_ref[...]

    stop_ref[...] = jax.nn.sigmoid(logit)
    h_out_ref[...] = h_new
    c_out_ref[...] = c_new


def _rollout_kernel(xg_ref, h0_ref, c0_ref, whh_ref, wout_ref, bout_ref,
                    stops_ref, h_out_ref, c_out_ref, h_state, c_state,
                    *, hp, tc, t_total, unroll, guard):
    """One grid step = `tc` recurrent LSTM steps on one streamed xg chunk.

    xg (bf16, x @ W_ih^T + b precomputed for every step) is pipelined in by
    BlockSpec; W_hh stays VMEM-resident; h/c persist across chunks in VMEM
    scratch.  Per-step logits are merged into a lane-dense (B, tc) carry with
    a one-hot select; one dense sigmoid + dense store per chunk.
    """
    chunk = pl.program_id(0)

    @pl.when(chunk == 0)
    def _():
        h_state[...] = h0_ref[...]
        c_state[...] = c0_ref[...]

    b = h0_ref.shape[0]
    wout = wout_ref[...]                                  # (1, Hp) f32 (tiny)
    bout = bout_ref[...]                                  # (1, 1)  f32
    base = chunk * tc
    lane_ids = jax.lax.broadcasted_iota(jnp.int32, (1, tc), 1)   # hoisted

    # TODO(synk): on v6e/v7x, hold W_hh in MXU weight registers across steps
    # (pltpu.matmul_push_rhs / matmul_acc_lhs / matmul_pop, RHS split across
    # the MXUs since 4*Hp > 256) to drop the per-step weight push.
    def step(t, carry):
        h, c, logits = carry                              # (B,Hp),(B,Hp),(B,tc)
        gates = (xg_ref[t].astype(jnp.float32)
                 + jnp.dot(h.astype(whh_ref.dtype), whh_ref[...],
                           preferred_element_type=jnp.float32))
        i_g = jax.nn.sigmoid(gates[:, 0 * hp:1 * hp])
        f_g = jax.nn.sigmoid(gates[:, 1 * hp:2 * hp])
        g_g = jnp.tanh(gates[:, 2 * hp:3 * hp])
        o_g = jax.nn.sigmoid(gates[:, 3 * hp:4 * hp])
        c_new = f_g * c + i_g * g_g
        h_new = o_g * jnp.tanh(c_new)
        if guard:                                         # static: only if T padded
            valid = (base + t) < t_total
            h_new = jnp.where(valid, h_new, h)
            c_new = jnp.where(valid, c_new, c)
        logit = jnp.sum(h_new * wout, axis=-1, keepdims=True) + bout   # (B, 1)
        logits = jnp.where(lane_ids == t, logit, logits)  # one-hot lane merge
        return h_new, c_new, logits

    h, c, logits = jax.lax.fori_loop(
        0, tc, step,
        (h_state[...], c_state[...], jnp.zeros((b, tc), jnp.float32)),
        unroll=unroll)

    h_state[...] = h
    c_state[...] = c
    stops_ref[0] = jax.nn.sigmoid(logits)     # one dense sigmoid + dense store
    # Revisited block-0 outputs: the last chunk's value is what lands in HBM.
    h_out_ref[...] = h
    c_out_ref[...] = c


# ---------------------------------------------------------------------------
# Parameter preparation (done once, outside the decode loop)
# ---------------------------------------------------------------------------

def _pad_cols(a, width):
    pad = width - a.shape[-1]
    if pad == 0:
        return a
    return jnp.pad(a, [(0, 0)] * (a.ndim - 1) + [(0, pad)])


def prepare_params(params, weight_dtype=jnp.bfloat16):
    """Pack / pad / cast the PyTorch-layout parameters for the kernels."""
    H = params["h_0"].shape[0]
    D = params["w_ih"].shape[1]
    Hp = ((H + 127) // 128) * 128            # lane-aligned per-gate width

    def pad_gates_cols(m):                    # (..., 4H) -> (..., 4Hp), per gate
        parts = jnp.split(m, 4, axis=-1)
        return jnp.concatenate([_pad_cols(p, Hp) for p in parts], axis=-1)

    wih_p = pad_gates_cols(params["w_ih"].T)                      # (D, 4Hp)
    whh_p = pad_gates_cols(params["w_hh"].T)                      # (H, 4Hp)
    whh_p = jnp.pad(whh_p, ((0, Hp - H), (0, 0)))                 # zero pad rows
    b_p = pad_gates_cols((params["b_ih"] + params["b_hh"])[None]) # (1, 4Hp)
    w_out_p = _pad_cols(params["w_out"], Hp)                      # (1, Hp)
    b_out = params["b_out"].reshape(1, 1)
    h0_p = _pad_cols(params["h_0"][None, :], Hp)[0]               # (Hp,)
    c0_p = _pad_cols(params["c_0"][None, :], Hp)[0]

    # TODO(synk): for small H (<=32) pack the four gates into 4*H lanes (one
    # 128-lane vreg) and align i/f/g/o with pltpu.roll instead of per-gate
    # 128-lane padding; recovers ~4x on gate-matmul width and xg bytes.
    return dict(
        D=D, H=H, Hp=Hp,
        w_ih_p=wih_p.astype(weight_dtype),
        w_hh_p=whh_p.astype(weight_dtype),
        b_p=b_p.astype(jnp.float32),
        w_out_p=w_out_p.astype(jnp.float32),
        b_out=b_out.astype(jnp.float32),
        h0_p=h0_p.astype(jnp.float32),
        c0_p=c0_p.astype(jnp.float32),
    )


def _pad_state(s, batch, hp):
    s = jnp.asarray(s, jnp.float32)
    if s.ndim == 1:
        s = s[None, :]
    if s.shape[-1] != hp:
        s = jnp.pad(s, ((0, 0), (0, hp - s.shape[-1])))
    if s.shape[0] != batch:
        s = jnp.broadcast_to(s, (batch, hp))
    return s


# ---------------------------------------------------------------------------
# Forward wrappers
# ---------------------------------------------------------------------------

def stop_control_forward(prep, inputs, hx=None):
    """Single step, mirrors StopControl.forward.

    Returns (stop_probs (B,), (h, c)) where h, c are the lane-padded (B, Hp)
    state; feed them straight back as hx, or slice [:, :H] for the module view.
    """
    B = inputs.shape[0]
    Hp = prep["Hp"]

    if hx is None:
        h = jnp.broadcast_to(prep["h0_p"][None, :], (B, Hp))
        c = jnp.broadcast_to(prep["c0_p"][None, :], (B, Hp))
    else:
        h, c = hx
        h = _pad_state(h, B, Hp)
        c = _pad_state(c, B, Hp)

    stop, h_new, c_new = pl.pallas_call(
        functools.partial(_step_kernel, hp=Hp),
        out_shape=(
            jax.ShapeDtypeStruct((B, 1), jnp.float32),
            jax.ShapeDtypeStruct((B, Hp), jnp.float32),
            jax.ShapeDtypeStruct((B, Hp), jnp.float32),
        ),
        in_specs=[_VMEM] * 8,
        out_specs=(_VMEM, _VMEM, _VMEM),
        input_output_aliases={1: 1, 2: 2},        # h -> h_out, c -> c_out
    )(inputs, h, c, prep["w_ih_p"], prep["w_hh_p"], prep["b_p"],
      prep["w_out_p"], prep["b_out"])

    return stop[:, 0], (h_new, c_new)


def _choose_chunk(t_steps, batch, hp, chunk_steps):
    if chunk_steps is not None:
        return max(1, min(int(chunk_steps), t_steps))
    bytes_per_step = batch * 4 * hp * 2                   # one bf16 xg step
    tc = max(1, (4 << 20) // max(1, bytes_per_step))      # ~4 MiB xg per chunk
    return int(min(tc, 128, t_steps))


def stop_control_rollout(prep, xs, hx=None, chunk_steps=None):
    """Fused T-step rollout; xg streamed chunk-by-chunk through one pallas_call.

    xs: (T, B, D).  Returns (stops (T, B), (h, c)) with padded (B, Hp) state.
    """
    T, B, D = xs.shape
    Hp = prep["Hp"]
    wdt = prep["w_ih_p"].dtype

    if hx is None:
        h = jnp.broadcast_to(prep["h0_p"][None, :], (B, Hp))
        c = jnp.broadcast_to(prep["c0_p"][None, :], (B, Hp))
    else:
        h, c = hx
        h = _pad_state(h, B, Hp)
        c = _pad_state(c, B, Hp)

    tc = _choose_chunk(T, B, Hp, chunk_steps)
    num_chunks = pl.cdiv(T, tc)
    Tp = num_chunks * tc
    unroll = tc if tc <= 8 else next(u for u in (8, 4, 2, 1) if tc % u == 0)

    # One big input projection for all T steps (bias folded in); the streamed
    # operand is downcast to bf16 to halve the dominant HBM->VMEM DMA.
    xg = jnp.dot(xs.reshape(T * B, D).astype(wdt), prep["w_ih_p"],
                 preferred_element_type=jnp.float32)
    xg = (xg + prep["b_p"]).astype(jnp.bfloat16).reshape(T, B, 4 * Hp)
    if Tp != T:
        xg = jnp.pad(xg, ((0, Tp - T), (0, 0), (0, 0)))   # padded steps guarded

    # Scoped-VMEM budget: double-buffered xg/stops chunks + resident weights
    # and state + slack (v7x physical VMEM is 64 MiB).
    need = (2 * tc * B * 4 * Hp * 2 + 2 * B * tc * 4
            + Hp * 4 * Hp * 2 + 8 * B * Hp * 4 + 8 * Hp * 4 + (2 << 20))
    vmem_limit = int(min(max(need, 32 << 20), 64 << 20))

    kernel = functools.partial(_rollout_kernel, hp=Hp, tc=tc, t_total=T,
                               unroll=unroll, guard=(Tp != T))

    stops_chunks, h_new, c_new = pl.pallas_call(
        kernel,
        grid=(num_chunks,),
        out_shape=(
            jax.ShapeDtypeStruct((num_chunks, B, tc), jnp.float32),
            jax.ShapeDtypeStruct((B, Hp), jnp.float32),
            jax.ShapeDtypeStruct((B, Hp), jnp.float32),
        ),
        in_specs=[
            pl.BlockSpec((tc, B, 4 * Hp), lambda i: (i, 0, 0)),   # streamed xg
            pl.BlockSpec((B, Hp), lambda i: (0, 0)),              # h0 (fetched once)
            pl.BlockSpec((B, Hp), lambda i: (0, 0)),              # c0
            pl.BlockSpec((Hp, 4 * Hp), lambda i: (0, 0)),         # W_hh (resident)
            pl.BlockSpec((1, Hp), lambda i: (0, 0)),              # w_out
            pl.BlockSpec((1, 1), lambda i: (0, 0)),               # b_out
        ],
        out_specs=(
            pl.BlockSpec((1, B, tc), lambda i: (i, 0, 0)),        # lane-dense stops
            pl.BlockSpec((B, Hp), lambda i: (0, 0)),
            pl.BlockSpec((B, Hp), lambda i: (0, 0)),
        ),
        scratch_shapes=[pltpu.VMEM((B, Hp), jnp.float32),          # persistent h
                        pltpu.VMEM((B, Hp), jnp.float32)],         # persistent c
        compiler_params=pltpu.CompilerParams(
            dimension_semantics=("arbitrary",),
            vmem_limit_bytes=vmem_limit),
    )(xg, h, c, prep["w_hh_p"], prep["w_out_p"], prep["b_out"])

    # TODO(synk): for large B on v7x, add a leading "parallel" grid axis over
    # batch chunks so the two TensorCores run independent batch slices.
    stops = stops_chunks.transpose(0, 2, 1).reshape(Tp, B)[:T]
    return stops, (h_new, c_new)


# ---------------------------------------------------------------------------
# Synthetic parameters (nn.LSTMCell / nn.Linear shapes)
# ---------------------------------------------------------------------------

def init_params(key, input_size, hidden_size):
    ks = jax.random.split(key, 8)
    k = 1.0 / jnp.sqrt(hidden_size)
    return {
        "w_ih": jax.random.uniform(ks[0], (4 * hidden_size, input_size),
                                   jnp.float32, -k, k),
        "w_hh": jax.random.uniform(ks[1], (4 * hidden_size, hidden_size),
                                   jnp.float32, -k, k),
        "b_ih": jax.random.uniform(ks[2], (4 * hidden_size,), jnp.float32, -k, k),
        "b_hh": jax.random.uniform(ks[3], (4 * hidden_size,), jnp.float32, -k, k),
        "w_out": jax.random.uniform(ks[4], (1, hidden_size), jnp.float32, -k, k),
        "b_out": jnp.zeros((1,), jnp.float32),   # bias.data.fill_(0.0)
        "h_0": jax.random.normal(ks[5], (hidden_size,), jnp.float32),
        "c_0": jax.random.normal(ks[6], (hidden_size,), jnp.float32),
    }


# ---------------------------------------------------------------------------
# Test
# ---------------------------------------------------------------------------

if __name__ == "__main__":
    B, D, H, T = 2, 32, 32, 8
    key = jax.random.PRNGKey(0)
    pkey, xkey = jax.random.split(key)

    params = init_params(pkey, D, H)
    prep = prepare_params(params)
    xs = jax.random.normal(xkey, (T, B, D), jnp.float32)

    # Pure-JAX f32 reference (PyTorch LSTMCell semantics, gate order i,f,g,o).
    def ref_step(x, h, c):
        gates = (x @ params["w_ih"].T + h @ params["w_hh"].T
                 + params["b_ih"] + params["b_hh"])
        i, f, g, o = jnp.split(gates, 4, axis=-1)
        i, f, o = jax.nn.sigmoid(i), jax.nn.sigmoid(f), jax.nn.sigmoid(o)
        g = jnp.tanh(g)
        c = f * c + i * g
        h = o * jnp.tanh(c)
        stop = jax.nn.sigmoid((h @ params["w_out"].T + params["b_out"])[:, 0])
        return stop, h, c

    stops_ref, hs_ref, cs_ref = [], [], []
    h_r = jnp.broadcast_to(params["h_0"][None, :], (B, H))
    c_r = jnp.broadcast_to(params["c_0"][None, :], (B, H))
    for t in range(T):
        s_r, h_r, c_r = ref_step(xs[t], h_r, c_r)
        stops_ref.append(s_r); hs_ref.append(h_r); cs_ref.append(c_r)
    stops_ref = jnp.stack(stops_ref)

    # --- single-step kernel, hx=None path (learned h_0/c_0) ---
    stop0, (h1, c1) = stop_control_forward(prep, xs[0], hx=None)
    jax.block_until_ready((stop0, h1, c1))
    assert stop0.shape == (B,) and h1.shape == (B, prep["Hp"])
    assert jnp.allclose(stop0, stops_ref[0], atol=5e-2)
    assert jnp.allclose(h1[:, :H], hs_ref[0], atol=5e-2)
    assert jnp.allclose(c1[:, :H], cs_ref[0], atol=5e-2)

    # --- single-step kernel, explicit-hx path (state aliased in/out) ---
    stop1, (h2, c2) = stop_control_forward(prep, xs[1], hx=(h1, c1))
    jax.block_until_ready((stop1, h2, c2))
    assert jnp.allclose(stop1, stops_ref[1], atol=5e-2)

    # --- fused rollout (single chunk for this T) ---
    stops, (hT, cT) = stop_control_rollout(prep, xs, hx=None)
    jax.block_until_ready((stops, hT, cT))
    assert stops.shape == (T, B)
    assert jnp.allclose(stops, stops_ref, atol=5e-2)
    assert jnp.allclose(hT[:, :H], hs_ref[-1], atol=5e-2)
    assert jnp.allclose(cT[:, :H], cs_ref[-1], atol=5e-2)
    assert jnp.allclose(stops[0], stop0, atol=2e-2)
    assert jnp.allclose(stops[1], stop1, atol=2e-2)

    # --- streamed rollout with a non-dividing chunk (exercises the grid
    #     pipeline, persistent h/c scratch and the padded-step guard) ---
    stops_c, (hTc, cTc) = stop_control_rollout(prep, xs, hx=None, chunk_steps=3)
    jax.block_until_ready((stops_c, hTc, cTc))
    assert jnp.allclose(stops_c, stops, atol=1e-4)
    assert jnp.allclose(hTc, hT, atol=1e-4)
    assert jnp.allclose(cTc, cT, atol=1e-4)

    # --- rollout resuming from explicit (padded) state ---
    stops_tail, _ = stop_control_rollout(prep, xs[2:], hx=(h2, c2))
    jax.block_until_ready(stops_tail)
    assert jnp.allclose(stops_tail, stops_ref[2:], atol=5e-2)

    print("KERNEL_OK")
</pallas_src>

<mosaic_0001>
module attributes {stable_mosaic.version = 11 : i64} {
  func.func @_step_kernel(%arg0: memref<2x32xf32, #tpu.memory_space<vmem>>, %arg1: memref<2x128xf32, #tpu.memory_space<vmem>>, %arg2: memref<2x128xf32, #tpu.memory_space<vmem>>, %arg3: memref<32x512xbf16, #tpu.memory_space<vmem>>, %arg4: memref<128x512xbf16, #tpu.memory_space<vmem>>, %arg5: memref<1x512xf32, #tpu.memory_space<vmem>>, %arg6: memref<1x128xf32, #tpu.memory_space<vmem>>, %arg7: memref<1x1xf32, #tpu.memory_space<vmem>>, %arg8: memref<2x1xf32, #tpu.memory_space<vmem>>, %arg9: memref<2x128xf32, #tpu.memory_space<vmem>>, %arg10: memref<2x128xf32, #tpu.memory_space<vmem>>) attributes {dimension_semantics = [], scalar_prefetch = 0 : i64, scratch_operands = 0 : i64, tpu.core_type = #tpu.core_type<tc>} {
    %c0 = arith.constant 0 : index
    %c0_0 = arith.constant 0 : index
    %0 = vector.load %arg0[%c0, %c0_0] : memref<2x32xf32, #tpu.memory_space<vmem>>, vector<2x32xf32>
    %1 = arith.truncf %0 : vector<2x32xf32> to vector<2x32xbf16>
    %c0_1 = arith.constant 0 : index
    %c0_2 = arith.constant 0 : index
    %2 = vector.load %arg3[%c0_1, %c0_2] : memref<32x512xbf16, #tpu.memory_space<vmem>>, vector<32x512xbf16>
    %cst = arith.constant dense<0.000000e+00> : vector<2x512xf32>
    %3 = tpu.matmul %1, %2, %cst {dimension_numbers = #tpu.dot_dimension_numbers<[1], [0], [0], [1], [0, 0, 1, 1], [], []>} : vector<2x32xbf16>, vector<32x512xbf16>, vector<2x512xf32> -> vector<2x512xf32>
    %c0_3 = arith.constant 0 : index
    %c0_4 = arith.constant 0 : index
    %4 = vector.load %arg1[%c0_3, %c0_4] : memref<2x128xf32, #tpu.memory_space<vmem>>, vector<2x128xf32>
    %5 = arith.truncf %4 : vector<2x128xf32> to vector<2x128xbf16>
    %c0_5 = arith.constant 0 : index
    %c0_6 = arith.constant 0 : index
    %6 = vector.load %arg4[%c0_5, %c0_6] : memref<128x512xbf16, #tpu.memory_space<vmem>>, vector<128x512xbf16>
    %cst_7 = arith.constant dense<0.000000e+00> : vector<2x512xf32>
    %7 = tpu.matmul %5, %6, %cst_7 {dimension_numbers = #tpu.dot_dimension_numbers<[1], [0], [0], [1], [0, 0, 1, 1], [], []>} : vector<2x128xbf16>, vector<128x512xbf16>, vector<2x512xf32> -> vector<2x512xf32>
    %8 = arith.addf %3, %7 : vector<2x512xf32>
    %c0_8 = arith.constant 0 : index
    %c0_9 = arith.constant 0 : index
    %9 = vector.load %arg5[%c0_8, %c0_9] : memref<1x512xf32, #tpu.memory_space<vmem>>, vector<1x512xf32>
    %10 = vector.broadcast %9 : vector<1x512xf32> to vector<2x512xf32>
    %11 = arith.addf %8, %10 : vector<2x512xf32>
    %12 = vector.extract_strided_slice %11 {offsets = [0, 0], sizes = [2, 128], strides = [1, 1]} : vector<2x512xf32> to vector<2x128xf32>
    %13 = arith.negf %12 : vector<2x128xf32>
    %14 = math.exp %13 : vector<2x128xf32>
    %cst_10 = arith.constant 1.000000e+00 : f32
    %15 = vector.broadcast %cst_10 : f32 to vector<2x128xf32>
    %16 = arith.addf %15, %14 : vector<2x128xf32>
    %17 = arith.divf %15, %16 : vector<2x128xf32>
    %18 = vector.extract_strided_slice %11 {offsets = [0, 128], sizes = [2, 128], strides = [1, 1]} : vector<2x512xf32> to vector<2x128xf32>
    %19 = arith.negf %18 : vector<2x128xf32>
    %20 = math.exp %19 : vector<2x128xf32>
    %cst_11 = arith.constant 1.000000e+00 : f32
    %21 = vector.broadcast %cst_11 : f32 to vector<2x128xf32>
    %22 = arith.addf %21, %20 : vector<2x128xf32>
    %23 = arith.divf %21, %22 : vector<2x128xf32>
    %24 = vector.extract_strided_slice %11 {offsets = [0, 256], sizes = [2, 128], strides = [1, 1]} : vector<2x512xf32> to vector<2x128xf32>
    %25 = math.tanh %24 : vector<2x128xf32>
    %26 = vector.extract_strided_slice %11 {offsets = [0, 384], sizes = [2, 128], strides = [1, 1]} : vector<2x512xf32> to vector<2x128xf32>
    %27 = arith.negf %26 : vector<2x128xf32>
    %28 = math.exp %27 : vector<2x128xf32>
    %cst_12 = arith.constant 1.000000e+00 : f32
    %29 = vector.broadcast %cst_12 : f32 to vector<2x128xf32>
    %30 = arith.addf %29, %28 : vector<2x128xf32>
    %31 = arith.divf %29, %30 : vector<2x128xf32>
    %c0_13 = arith.constant 0 : index
    %c0_14 = arith.constant 0 : index
    %32 = vector.load %arg2[%c0_13, %c0_14] : memref<2x128xf32, #tpu.memory_space<vmem>>, vector<2x128xf32>
    %33 = arith.mulf %23, %32 : vector<2x128xf32>
    %34 = arith.mulf %17, %25 : vector<2x128xf32>
    %35 = arith.addf %33, %34 : vector<2x128xf32>
    %36 = math.tanh %35 : vector<2x128xf32>
    %37 = arith.mulf %31, %36 : vector<2x128xf32>
    %c0_15 = arith.constant 0 : index
    %c0_16 = arith.constant 0 : index
    %38 = vector.load %arg6[%c0_15, %c0_16] : memref<1x128xf32, #tpu.memory_space<vmem>>, vector<1x128xf32>
    %39 = vector.broadcast %38 : vector<1x128xf32> to vector<2x128xf32>
    %40 = arith.mulf %37, %39 : vector<2x128xf32>
    %cst_17 = arith.constant dense<0.000000e+00> : vector<2xf32>
    %41 = vector.multi_reduction <add>, %40, %cst_17 [1] : vector<2x128xf32> to vector<2xf32>
    %42 = vector.shape_cast %41 : vector<2xf32> to vector<2x1xf32>
    %c0_18 = arith.constant 0 : index
    %c0_19 = arith.constant 0 : index
    %43 = vector.load %arg7[%c0_18, %c0_19] : memref<1x1xf32, #tpu.memory_space<vmem>>, vector<1x1xf32>
    %44 = vector.broadcast %43 : vector<1x1xf32> to vector<2x1xf32>
    %45 = arith.addf %42, %44 : vector<2x1xf32>
    %46 = arith.negf %45 : vector<2x1xf32>
    %47 = math.exp %46 : vector<2x1xf32>
    %cst_20 = arith.constant 1.000000e+00 : f32
    %48 = vector.broadcast %cst_20 : f32 to vector<2x1xf32>
    %49 = arith.addf %48, %47 : vector<2x1xf32>
    %50 = arith.divf %48, %49 : vector<2x1xf32>
    %c0_21 = arith.constant 0 : index
    %c0_22 = arith.constant 0 : index
    %51 = vector.load %arg8[%c0_21, %c0_22] : memref<2x1xf32, #tpu.memory_space<vmem>>, vector<2x1xf32>
    tpu.vector_store %arg8[%c0_21, %c0_22], %50 {strides = array<i32>} : memref<2x1xf32, #tpu.memory_space<vmem>>, vector<2x1xf32>,
    %c0_23 = arith.constant 0 : index
    %c0_24 = arith.constant 0 : index
    %52 = vector.load %arg9[%c0_23, %c0_24] : memref<2x128xf32, #tpu.memory_space<vmem>>, vector<2x128xf32>
    tpu.vector_store %arg9[%c0_23, %c0_24], %37 {strides = array<i32>} : memref<2x128xf32, #tpu.memory_space<vmem>>, vector<2x128xf32>,
    %c0_25 = arith.constant 0 : index
    %c0_26 = arith.constant 0 : index
    %53 = vector.load %arg10[%c0_25, %c0_26] : memref<2x128xf32, #tpu.memory_space<vmem>>, vector<2x128xf32>
    tpu.vector_store %arg10[%c0_25, %c0_26], %35 {strides = array<i32>} : memref<2x128xf32, #tpu.memory_space<vmem>>, vector<2x128xf32>,
    return
  }
}

</mosaic_0001>

<bundles_post_ra>
// kernel: tpu_custom_call.1
= control target key start
LH: loop header
LB: loop body
LE: loop exit
PB: predicated region body
PF: predicated region fallthrough
CT: control target
= control target key end

     0   :  { %s866_s0 = inlined_call_operand.vmem [shape: f32[2,32], index: 0, kind: input, shape index: {}]   ;;  %s867_s1 = inlined_call_operand.vmem [shape: f32[2,128], index: 1, kind: input, shape index: {}, may-alias: {1,9}]   ;;  %s868_s2 = inlined_call_operand.vmem [shape: f32[2,128], index: 2, kind: input, shape index: {}, may-alias: {2,10}]   ;;  %s869_s3 = inlined_call_operand.hbm [shape: bf16[32,512], index: 3, kind: input, shape index: {}]   ;;  %s870_s4 = inlined_call_operand.hbm [shape: bf16[128,512], index: 4, kind: input, shape index: {}]   ;;  %s871_s5 = inlined_call_operand.vmem [shape: f32[1,512], index: 5, kind: input, shape index: {}]   ;;  %s872_s6 = inlined_call_operand.vmem [shape: f32[1,128], index: 6, kind: input, shape index: {}]   ;;  %s873_s7 = inlined_call_operand.<no memory space> [shape: f32[1,1], index: 7, kind: input, shape index: {}]   ;;  %s874_s8 = inlined_call_operand.vmem [shape: f32[2,1], index: 8, kind: output, shape index: {0}]   ;;  %s875_s9 = inlined_call_operand.vmem [shape: f32[2,128], index: 9, kind: output, shape index: {1}, may-alias: {1,9}]   ;;  %s876_s10 = inlined_call_operand.vmem [shape: f32[2,128], index: 10, kind: output, shape index: {2}, may-alias: {2,10}]  }
   0x1   :  { %v16_v0 = vstv %s873_s7 }
   0x2   :  { %17 = vst [vmem:[#allocation2] sm:$0x1] %v16_v0 }
   0x3   :  { %18 = vsyncpa [#allocation4], 0 }
   0x4   :  { %19 = vsyncpa [#allocation6], 0  ;;  %s751_s15 = smov [#allocation3]   ;;  %s703_s19 = scalar_lea.hbm %s869_s3, 1024 }
   0x5   :  { %s31_s16 = sshll.u32 %s751_s15, 4  ;;  %p704_p0 = scmp.ne.s32.totalorder %s869_s3, %s703_s19  ;;  %s32_s16 = int_to_ptr.vmem [resolvable:$true] %s31_s16 }
   0x6   :  { %p707_p1 = scmp.lt.u32.totalorder %s703_s19, %s869_s3 }
   0x8   :  { %p709_p2 = pnand %p707_p1, %p704_p0 }
   0xa   :  { %712 = shalt.err (!%p709_p2)
}
   0xb   :  { %s713_s7 = scalar_lea.vmem %s32_s16, 1024  ;;  %p718_p4 = scmp.lt.s32.totalorder %s32_s16, %s32_s16 }
   0xc   :  { %p714_p3 = scmp.ne.s32.totalorder %s32_s16, %s713_s7  ;;  %p719_p5 = scmp.lt.s32.totalorder %s713_s7, %s713_s7 }
   0xe   :  { %p720_p6 = por %p719_p5, %p718_p4 }
  0x10   :  { %p721_p7 = pnand %p720_p6, %p714_p3 }
  0x12   :  { %724 = shalt.err (!%p721_p7)
}
  0x13   :  { %s752_s24 = smov 256   ;;  %s753_s25 = smov 16  }
  0x14   :  { %37 = dma.hbm_to_vmem [thread:$0]  %s869_s3, 1024, %s32_s16, [#allocation4], %s752_s24, %s752_s24, %s753_s25  }
  0x15   :  { %s754_s28 = smov [#allocation5]   ;;  %s725_s12 = scalar_lea.hbm %s870_s4, 4096 }
  0x16   :  { %s43_s29 = sshll.u32 %s754_s28, 4  ;;  %p726_p8 = scmp.ne.s32.totalorder %s870_s4, %s725_s12  ;;  %s44_s29 = int_to_ptr.vmem [resolvable:$true] %s43_s29 }
  0x17   :  { %p729_p9 = scmp.lt.u32.totalorder %s725_s12, %s870_s4 }
  0x19   :  { %p731_p10 = pnand %p729_p9, %p726_p8 }
  0x1b   :  { %734 = shalt.err (!%p731_p10)
}
  0x1c   :  { %s735_s18 = scalar_lea.vmem %s44_s29, 4096  ;;  %p740_p12 = scmp.lt.s32.totalorder %s44_s29, %s44_s29 }
  0x1d   :  { %p736_p11 = scmp.ne.s32.totalorder %s44_s29, %s735_s18  ;;  %p741_p13 = scmp.lt.s32.totalorder %s735_s18, %s735_s18 }
  0x1f   :  { %p742_p0 = por %p741_p13, %p740_p12 }
  0x21   :  { %p743_p1 = pnand %p742_p0, %p736_p11 }
  0x23   :  { %746 = shalt.err (!%p743_p1)
}
  0x24   :  { %49 = dma.hbm_to_vmem [thread:$0]  %s870_s4, 4096, %s44_s29, [#allocation6], %s752_s24, %s752_s24, %s753_s25  }
  0x25   :  { %747 = dma.done.wait [#allocation4], 1024  }
  0x26   :  { %748 = vsyncadd [#allocation4], 4294966272 }
  0x27   :  { %749 = dma.done.wait [#allocation6], 4096  }
  0x28   :  { %750 = vsyncadd [#allocation6], 4294963200  ;;  %v755_v1 = vmov 0   ;;  %v623_v2 = vld [vmem:[#allocation5 + $0x4] ss:$16 sps:$4 sm:$0xff]   ;;  %vm389_vm0 = vcmask 261120   ;;  %v477_v46 = vlaneseq }
  0x29   :  { %299 = vmatprep.mubr.bf16.mxu0 %v755_v1  ;;  %340 = vmatprep.mubr.bf16.mxu1 %v755_v1  ;;  %v625_v3 = vld [vmem:[#allocation5] ss:$16 sps:$4 sm:$0xff]   ;;  %v626_v4 = vld [vmem:[#allocation5 + $0x24] ss:$16 sps:$4 sm:$0xff]   ;;  %v629_v6 = vld [vmem:[#allocation5 + $0xc] ss:$16 sps:$4 sm:$0xff]  }
  0x2a   :  { %267 = vmatprep.subr.bf16.mxu0 %v623_v2  ;;  %v628_v5 = vld [vmem:[#allocation5 + $0x20] ss:$16 sps:$4 sm:$0xff]   ;;  %v631_v7 = vld [vmem:[#allocation5 + $0x44] ss:$16 sps:$4 sm:$0xff]   ;;  %v633_v8 = vld [vmem:[#allocation5 + $0x8] ss:$16 sps:$4 sm:$0xff]   ;;  %308 = vmatprep.subr.bf16.mxu1 %v629_v6 }
  0x2b   :  { %268 = vmatpush1.bf16.msra.mxu0 %v625_v3  ;;  %309 = vmatpush1.bf16.msra.mxu1 %v633_v8  ;;  %v635_v9 = vld [vmem:[#allocation5 + $0x2c] ss:$16 sps:$4 sm:$0xff]   ;;  %v634_v10 = vld [vmem:[#allocation5 + $0x40] ss:$16 sps:$4 sm:$0xff]   ;;  %v637_v11 = vld [vmem:[#allocation5 + $0x64] ss:$16 sps:$4 sm:$0xff]  }
  0x2c   :  { %269 = vmatprep.subr.bf16.mxu0 %v626_v4  ;;  %v639_v12 = vld [vmem:[#allocation5 + $0x28] ss:$16 sps:$4 sm:$0xff]   ;;  %310 = vmatprep.subr.bf16.mxu1 %v635_v9  ;;  %v641_v13 = vld [vmem:[#allocation5 + $0x4c] ss:$16 sps:$4 sm:$0xff]   ;;  %v640_v14 = vld [vmem:[#allocation5 + $0x60] ss:$16 sps:$4 sm:$0xff]  }
  0x2d   :  { %v645_v15 = vld [vmem:[#allocation5 + $0x48] ss:$16 sps:$4 sm:$0xff]   ;;  %v647_v16 = vld [vmem:[#allocation5 + $0x6c] ss:$16 sps:$4 sm:$0xff]   ;;  %v643_v17 = vld [vmem:[#allocation5 + $0x84] ss:$16 sps:$4 sm:$0xff]  }
  0x2e   :  { %v651_v18 = vld [vmem:[#allocation5 + $0x68] ss:$16 sps:$4 sm:$0xff]   ;;  %v646_v19 = vld [vmem:[#allocation5 + $0x80] ss:$16 sps:$4 sm:$0xff]   ;;  %v653_v20 = vld [vmem:[#allocation5 + $0x8c] ss:$16 sps:$4 sm:$0xff]  }
  0x2f   :  { %270 = vmatpush1.bf16.msra.mxu0 %v628_v5  ;;  %311 = vmatpush1.bf16.msra.mxu1 %v639_v12  ;;  %v649_v21 = vld [vmem:[#allocation5 + $0xa4] ss:$16 sps:$4 sm:$0xff]   ;;  %v657_v22 = vld [vmem:[#allocation5 + $0x88] ss:$16 sps:$4 sm:$0xff]   ;;  %v652_v23 = vld [vmem:[#allocation5 + $0xa0] ss:$16 sps:$4 sm:$0xff]  }
  0x30   :  { %271 = vmatprep.subr.bf16.mxu0 %v631_v7  ;;  %312 = vmatprep.subr.bf16.mxu1 %v641_v13  ;;  %v659_v24 = vld [vmem:[#allocation5 + $0xac] ss:$16 sps:$4 sm:$0xff]   ;;  %v655_v25 = vld [vmem:[#allocation5 + $0xc4] ss:$16 sps:$4 sm:$0xff]   ;;  %v658_v26 = vld [vmem:[#allocation5 + $0xc0] ss:$16 sps:$4 sm:$0xff]  }
  0x31   :  { %v663_v27 = vld [vmem:[#allocation5 + $0xa8] ss:$16 sps:$4 sm:$0xff]   ;;  %v665_v28 = vld [vmem:[#allocation5 + $0xcc] ss:$16 sps:$4 sm:$0xff]   ;;  %v661_v29 = vld [vmem:[#allocation5 + $0xe4] ss:$16 sps:$4 sm:$0xff]  }
  0x32   :  { %v667_v30 = vld [vmem:[#allocation5 + $0xc8] ss:$16 sps:$4 sm:$0xff]   ;;  %v664_v31 = vld [vmem:[#allocation5 + $0xe0] ss:$16 sps:$4 sm:$0xff]   ;;  %v671_v33 = vld [vmem:[#allocation5 + $0xec] ss:$16 sps:$4 sm:$0xff]  }
  0x33   :  { %272 = vmatpush1.bf16.msra.mxu0 %v634_v10  ;;  %313 = vmatpush1.bf16.msra.mxu1 %v645_v15  ;;  %v73_v32 = vld [vmem:[%s867_s1] sm:$0x3]  ;;  %v670_v34 = vld [vmem:[#allocation3 + $0x4] ss:$16 sps:$4 sm:$0xff]   ;;  %v673_v36 = vld [vmem:[#allocation5 + $0xe8] ss:$16 sps:$4 sm:$0xff]  }
  0x34   :  { %273 = vmatprep.subr.bf16.mxu0 %v637_v11  ;;  %314 = vmatprep.subr.bf16.mxu1 %v647_v16  ;;  %v74_v35 = vpack.c.bf16 %v73_v32, %v73_v32  ;;  %v668_v37 = vld [vmem:[#allocation3] ss:$16 sps:$4 sm:$0xff]   ;;  %v676_v38 = vld [vmem:[#allocation3 + $0x24] ss:$16 sps:$4 sm:$0xff]   ;;  %v679_v39 = vld [vmem:[#allocation3 + $0xc] ss:$16 sps:$4 sm:$0xff]  }
  0x35   :  { %v677_v40 = vld [vmem:[#allocation3 + $0x8] ss:$16 sps:$4 sm:$0xff]   ;;  %v674_v41 = vld [vmem:[#allocation3 + $0x20] ss:$16 sps:$4 sm:$0xff]   ;;  %v682_v43 = vld [vmem:[#allocation3 + $0x2c] ss:$16 sps:$4 sm:$0xff]  }
  0x36   :  { %v63_v42 = vld [vmem:[%s866_s0] sm:$0x3]  ;;  %v680_v45 = vld [vmem:[#allocation3 + $0x28] ss:$16 sps:$4 sm:$0xff]   ;;  %v478_v47 = vshrl.u32 %v477_v46, 7  ;;  %vm534_vm1 = vcmask 1041408  }
  0x37   :  { %274 = vmatpush1.bf16.msra.mxu0 %v640_v14  ;;  %315 = vmatpush1.bf16.msra.mxu1 %v651_v18  ;;  %v64_v44 = vpack.c.bf16 %v63_v42, %v63_v42  ;;  %v475_v54 = vld [vmem:[%s871_s5] sm:$0xf]  ;;  %vm552_vm2 = vcmask 1024  }
  0x38   :  { %275 = vmatprep.subr.bf16.mxu0 %v643_v17  ;;  %316 = vmatprep.subr.bf16.mxu1 %v653_v20  ;;  %v479_v52 = vsub.s32 0, %v478_v47  ;;  %v483_v55 = vsub.s32 1, %v478_v47  ;;  %v491_v2 = vsub.s32 3, %v478_v47  ;;  %v487_v15 = vsub.s32 2, %v478_v47 }
  0x3a   :  { %v480_v59 = vrot.slane %v475_v54, %v479_v52  ;;  %v484_v61 = vrot.slane %v475_v54, %v483_v55  ;;  %v492_v13 = vrot.slane %v475_v54, %v491_v2  ;;  %v488_v17 = vrot.slane %v475_v54, %v487_v15 }
  0x3b   :  { %276 = vmatpush1.bf16.msra.mxu0 %v646_v19  ;;  %317 = vmatpush1.bf16.msra.mxu1 %v657_v22 }
  0x3c   :  { %277 = vmatprep.subr.bf16.mxu0 %v649_v21  ;;  %318 = vmatprep.subr.bf16.mxu1 %v659_v24 }
  0x3f   :  { %278 = vmatpush1.bf16.msra.mxu0 %v652_v23  ;;  %319 = vmatpush1.bf16.msra.mxu1 %v663_v27 }
  0x40   :  { %279 = vmatprep.subr.bf16.mxu0 %v655_v25  ;;  %320 = vmatprep.subr.bf16.mxu1 %v665_v28 }
  0x43   :  { %280 = vmatpush1.bf16.msra.mxu0 %v658_v26  ;;  %321 = vmatpush1.bf16.msra.mxu1 %v667_v30  ;;  %v520_v26 = vld [vmem:[%s868_s2] sm:$0x3] }
  0x44   :  { %281 = vmatprep.subr.bf16.mxu0 %v661_v29  ;;  %322 = vmatprep.subr.bf16.mxu1 %v671_v33 }
  0x47   :  { %282 = vmatpush1.bf16.msra.mxu0 %v664_v31  ;;  %323 = vmatpush1.bf16.msra.mxu1 %v673_v36 }
  0x48   :  { %393 = vmatprep.subr.bf16.mxu0 %v670_v34  ;;  %434 = vmatprep.subr.bf16.mxu1 %v679_v39  ;;  %v616_v39 = vld [vmem:[#allocation2] ss:$0 sm:$0xff] }
  0x4a   :  { %300 = vmatmul.mubr.bf16.vlgmr.msra.gmra.mrb[0].mxu0 %v74_v35  ;;  %341 = vmatmul.mubr.bf16.vlgmr.msra.gmra.mrb[0].mxu1 %v74_v35  ;;  %v615_v35 = vld [vmem:[%s872_s6] ss:$0 sm:$0xff] }
  0x4b   :  { %394 = vmatpush1.bf16.msra.mxu0 %v668_v37  ;;  %425 = vmatprep.mubr.bf16.mxu0 %v755_v1 }
  0x4c   :  { %395 = vmatprep.subr.bf16.mxu0 %v676_v38  ;;  %435 = vmatpush1.bf16.msra.mxu1 %v677_v40 }
  0x4d   :  { %466 = vmatprep.mubr.bf16.mxu1 %v755_v1  ;;  %436 = vmatprep.subr.bf16.mxu1 %v682_v43 }
  0x4f   :  { %396 = vmatpush1.bf16.msra.mxu0 %v674_v41 }
  0x50   :  { %437 = vmatpush1.bf16.msra.mxu1 %v680_v45 }
  0x52   :  { %610 = vmatmul.mubr.msk.bf16.vlgmr.msra.gmra.mrb[4].mxu0 %vm389_vm0, %v64_v44 }
  0x53   :  { %611 = vmatmul.mubr.msk.bf16.vlgmr.msra.gmra.mrb[4].mxu1 %vm389_vm0, %v64_v44 }
 0x11d   :  { %v301_v48 = vpop.f32.mrb[0].mxu0  ;;  %v342_v53 = vpop.f32.mrb[0].mxu1 }
 0x11e   :  { %v303_v49 = vpop.f32.mrb[1].mxu0  ;;  %v344_v56 = vpop.f32.mrb[1].mxu1 }
 0x11f   :  { %v305_v50 = vpop.f32.mrb[2].mxu0  ;;  %v346_v57 = vpop.f32.mrb[2].mxu1 }
 0x120   :  { %v306_v51 = vpop.f32.mrb[3].mxu0  ;;  %v347_v58 = vpop.f32.mrb[3].mxu1 }
 0x125   :  { %v427_v60 = vpop.f32.mrb[4].mxu0 }
 0x126   :  { %v428_v62 = vadd.f32 %v427_v60, %v301_v48  ;;  %v429_v63 = vpop.f32.mrb[5].mxu0  ;;  %v468_v5 = vpop.f32.mrb[4].mxu1 }
 0x127   :  { %v430_v0 = vadd.f32 %v429_v63, %v303_v49  ;;  %v431_v1 = vpop.f32.mrb[6].mxu0  ;;  %v469_v7 = vadd.f32 %v468_v5, %v342_v53  ;;  %v470_v8 = vpop.f32.mrb[5].mxu1 }
 0x128   :  { %v497_v3 = vadd.f32 %v480_v59, %v428_v62  ;;  %v432_v4 = vpop.f32.mrb[7].mxu0  ;;  %v471_v10 = vadd.f32 %v470_v8, %v344_v56  ;;  %v472_v11 = vpop.f32.mrb[6].mxu1 }
 0x129   :  { %v498_v6 = vadd.f32 %v484_v61, %v430_v0  ;;  %v473_v14 = vpop.f32.mrb[7].mxu1  ;;  %v499_v19 = vadd.f32 %v488_v17, %v469_v7 }
 0x12a   :  { %v612_v9 = vmul.f32 -1.442695, %v497_v3  ;;  %v500_v16 = vadd.f32 %v492_v13, %v471_v10 }
 0x12b   :  { %v613_v12 = vmul.f32 -1.442695, %v498_v6 }
 0x12c   :  { %683 = vpow2.f32 %v612_v9  ;;  %v614_v18 = vmul.f32 -1.442695, %v500_v16 }
 0x12d   :  { %685 = vpow2.f32 %v613_v12 }
 0x12e   :  { %687 = vpow2.f32 %v614_v18 }
 0x12f   :  { %689 = vtanh.f32 %v499_v19 }
 0x136   :  { %v684_v20 = vpop.eup %683 }
 0x137   :  { %v686_v21 = vpop.eup %685  ;;  %v504_v22 = vadd.f32 1.0, %v684_v20 }
 0x138   :  { %v510_v23 = vadd.f32 1.0, %v686_v21  ;;  %v688_v24 = vpop.eup %687 }
 0x139   :  { %691 = vrcp.f32 %v504_v22  ;;  %v690_v25 = vpop.eup %689  ;;  %v517_v30 = vadd.f32 1.0, %v688_v24 }
 0x13a   :  { %693 = vrcp.f32 %v510_v23 }
 0x13b   :  { %695 = vrcp.f32 %v517_v30 }
 0x143   :  { %v692_v27 = vpop.eup %691 }
 0x144   :  { %v694_v28 = vpop.eup %693  ;;  %v522_v29 = vmul.f32 %v692_v27, %v690_v25 }
 0x145   :  { %v521_v31 = vmul.f32 %v694_v28, %v520_v26  ;;  %v696_v33 = vpop.eup %695 }
 0x147   :  { %v523_v32 = vadd.f32 %v522_v29, %v521_v31 }
 0x149   :  { %555 = vst [vmem:[%s876_s10] sm:$0x3] %v523_v32  ;;  %697 = vtanh.f32 %v523_v32 }
 0x153   :  { %v698_v34 = vpop.eup %697 }
 0x154   :  { %v525_v36 = vmul.f32 %v698_v34, %v696_v33 }
 0x156   :  { %v533_v37 = vmul.f32 %v615_v35, %v525_v36  ;;  %554 = vst [vmem:[%s875_s9] sm:$0x3] %v525_v36 }
 0x158   :  { %v535_v38 = vsel %vm534_vm1, %v533_v37, 0.0 }
 0x159   :  { %536 = vadd.xlane.f32.xlu0 %v535_v38 }
 0x1e6   :  { %v537_v40 = vpop.xlane.xlu0 %536 }
 0x1e7   :  { %v545_v41 = vadd.f32 %v616_v39, %v537_v40 }
 0x1e9   :  { %v617_v42 = vmul.f32 -1.442695, %v545_v41 }
 0x1eb   :  { %699 = vpow2.f32 %v617_v42 }
 0x1f5   :  { %v700_v43 = vpop.eup %699 }
 0x1f6   :  { %v549_v44 = vadd.f32 1.0, %v700_v43 }
 0x1f8   :  { %701 = vrcp.f32 %v549_v44 }
 0x202   :  { %v702_v45 = vpop.eup %701 }
 0x203   :  { %553 = vst.msk [vmem:[%s874_s8] sm:$0x3] %vm552_vm2, %v702_v45 }
 0x204   :  { %568 = vsyncpa [#allocation4], 1 }
 0x205   :  { %569 = vsyncpa [#allocation6], 1 }

</bundles_post_ra>
